<compile_context>
chip_gen: v6e
topology: v6e:2x2x1
jax: 0.10.0
libtpu: 0.0.40
codegen_flags: <defaults>
</compile_context>

<pallas_src>
import math
import functools

import jax
import jax.numpy as jnp
from jax.experimental import pallas as pl
from jax.experimental.pallas import tpu as pltpu

# CombinedMarginLoss ArcFace configuration used by the insightface trainer.
ARC_S = 64.0
ARC_M2 = 0.5
LOG_MIN = math.log(1e-30)          # DistCrossEntropy: loss.clamp_min_(1e-30).log_()


def _partial_fc_kernel(emb_ref, w_ref, lab_ref, logp_ref,
                       m_ref, l_ref, t_ref, inv_en_ref,
                       *, cos_m, sin_m, scale, tc):
    j = pl.program_id(1)
    nj = pl.num_programs(1)
    lab = lab_ref[...]                                        # (tb, 1) int32

    # ---- init per-row online-LSE state at the first C tile -------------------
    @pl.when(j == 0)
    def _init():
        emb = emb_ref[...].astype(jnp.float32)                # (tb, D)
        ss = jnp.sum(emb * emb, axis=-1, keepdims=True)
        inv_en_ref[...] = jax.lax.rsqrt(jnp.maximum(ss, 1e-24))   # 1/max(||e||,1e-12)
        m_ref[...] = jnp.full_like(m_ref, -jnp.inf)
        l_ref[...] = jnp.zeros_like(l_ref)
        t_ref[...] = jnp.zeros_like(t_ref)

    # ---- cosine logits for this (tb, tc) tile ---------------------------------
    w = w_ref[...].astype(jnp.float32)                        # (tc, D)
    inv_wn = jax.lax.rsqrt(
        jnp.maximum(jnp.sum(w * w, axis=-1, keepdims=True), 1e-24))  # (tc, 1)
    w_n = (w * inv_wn).astype(jnp.bfloat16)                   # unit rows, bf16 MXU operand
    emb_bf = emb_ref[...].astype(jnp.bfloat16)

    raw = jax.lax.dot_general(emb_bf, w_n, (((1,), (1,)), ((), ())),
                              preferred_element_type=jnp.float32)    # (tb, tc) f32
    cos = jnp.clip(raw * inv_en_ref[...], -1.0, 1.0)

    # ---- ArcFace margin, target column only -----------------------------------
    # TODO(synk): labels could be scalar-prefetched into SMEM to skip the mask on
    # tiles that cannot contain any target; the iota-compare here is MXU-hidden filler.
    col = jax.lax.broadcasted_iota(jnp.int32, cos.shape, 1) + j * tc
    one_hot = col == lab                                      # label == -1 never matches
    in_tile = (lab >= j * tc) & (lab < (j + 1) * tc)          # (tb, 1) bool
    tgt_cos = jnp.sum(jnp.where(one_hot, cos, 0.0), axis=-1, keepdims=True)  # (tb, 1)
    sin = jnp.sqrt(jnp.maximum(1.0 - tgt_cos * tgt_cos, 0.0))
    margin = tgt_cos * cos_m - sin * sin_m                    # (tb, 1)

    logits = jnp.where(one_hot, margin, cos) * scale          # (tb, tc)

    # ---- online log-sum-exp accumulation over the C axis ----------------------
    m_prev = m_ref[...]
    m_new = jnp.maximum(m_prev, jnp.max(logits, axis=-1, keepdims=True))
    l_ref[...] = (l_ref[...] * jnp.exp(m_prev - m_new)
                  + jnp.sum(jnp.exp(logits - m_new), axis=-1, keepdims=True))
    m_ref[...] = m_new
    t_ref[...] = jnp.where(in_tile, margin * scale, t_ref[...])

    # ---- finalize: per-row log-prob of the target class -----------------------
    @pl.when(j == nj - 1)
    def _fin():
        logp = t_ref[...] - m_ref[...] - jnp.log(l_ref[...])  # log softmax at target
        logp = jnp.where(lab >= 0, logp, LOG_MIN)             # rows with label == -1
        logp_ref[...] = jnp.maximum(logp, LOG_MIN)            # torch clamp_min(1e-30)


def partial_fc_forward(local_embeddings, local_labels, weight_activated,
                       class_start=0, tb=None, tc=None):
    """Forward of PartialFC + DistCrossEntropy for rank 0 / world_size 1."""
    B, D = local_embeddings.shape
    C, D2 = weight_activated.shape
    assert D == D2

    if tb is None:
        tb = 128 if B % 128 == 0 else 8
    if tc is None:
        tc = 512 if C % 512 == 0 else (256 if C % 256 == 0 else 128)
    assert B % tb == 0 and C % tc == 0 and tb % 8 == 0 and tc % 128 == 0

    labels = local_labels.reshape(-1).astype(jnp.int32)
    in_range = (labels >= class_start) & (labels < class_start + C)
    labels = jnp.where(in_range, labels - class_start, -1).reshape(B, 1)

    kernel = functools.partial(
        _partial_fc_kernel,
        cos_m=float(math.cos(ARC_M2)),
        sin_m=float(math.sin(ARC_M2)),
        scale=float(ARC_S),
        tc=tc)

    esize = local_embeddings.dtype.itemsize
    # double-buffered input tiles + logit tile temporaries + per-row scratch, with slack
    vmem_est = 2 * (tb * D + tc * D) * esize + 8 * tb * tc * 4 + 8 * tb * 4 * 4
    vmem_limit = int(min(max(4 * vmem_est, 16 * 1024 * 1024), 48 * 1024 * 1024))

    cost = pl.CostEstimate(
        flops=2 * B * C * D,
        transcendentals=B * C + (B // tb) * C + 2 * B,
        bytes_accessed=B * D * esize + (B // tb) * C * D * esize + 8 * B)

    row_logp = pl.pallas_call(
        kernel,
        out_shape=jax.ShapeDtypeStruct((B, 1), jnp.float32),
        grid_spec=pltpu.PrefetchScalarGridSpec(
            num_scalar_prefetch=0,
            grid=(B // tb, C // tc),
            in_specs=[
                pl.BlockSpec((tb, D), lambda i, j: (i, 0)),   # embeddings
                pl.BlockSpec((tc, D), lambda i, j: (j, 0)),   # weight tile
                pl.BlockSpec((tb, 1), lambda i, j: (i, 0)),   # labels
            ],
            out_specs=pl.BlockSpec((tb, 1), lambda i, j: (i, 0)),
            scratch_shapes=[pltpu.VMEM((tb, 1), jnp.float32)] * 4),  # m, l, t, 1/||e||
        compiler_params=pltpu.CompilerParams(
            dimension_semantics=("parallel", "arbitrary"),
            vmem_limit_bytes=vmem_limit),
        cost_estimate=cost,
    )(local_embeddings, weight_activated, labels)

    # DistCrossEntropy: loss.clamp_min_(1e-30).log_().mean() * -1
    return -jnp.mean(row_logp)


if __name__ == "__main__":
    key = jax.random.PRNGKey(0)
    k_emb, k_w, k_lab = jax.random.split(key, 3)

    batch, embedding_size, num_classes = 16, 128, 512

    local_embeddings = jax.random.normal(k_emb, (batch, embedding_size), jnp.float32)
    # torch.normal(0, 0.01, (num_local, embedding_size))
    weight_activated = 0.01 * jax.random.normal(
        k_w, (num_classes, embedding_size), jnp.float32)
    local_labels = jax.random.randint(k_lab, (batch,), 0, num_classes, jnp.int32)
    local_labels = local_labels.at[3].set(-1)     # exercise the "not local" path

    loss = partial_fc_forward(local_embeddings, local_labels, weight_activated,
                              tb=8, tc=128)       # grid (2, 4)
    loss = jax.block_until_ready(loss)

    # ---- pure-JAX reference with the same (bf16-matmul, f32-accumulate) numerics ---
    inv_en = jax.lax.rsqrt(jnp.maximum(
        jnp.sum(local_embeddings * local_embeddings, axis=1, keepdims=True), 1e-24))
    inv_wn = jax.lax.rsqrt(jnp.maximum(
        jnp.sum(weight_activated * weight_activated, axis=1, keepdims=True), 1e-24))
    w_n = (weight_activated * inv_wn).astype(jnp.bfloat16)
    raw = jnp.dot(local_embeddings.astype(jnp.bfloat16), w_n.T,
                  preferred_element_type=jnp.float32)
    cos = jnp.clip(raw * inv_en, -1.0, 1.0)
    lab = local_labels.reshape(-1, 1)
    oh = jnp.arange(num_classes)[None, :] == lab
    tgt = jnp.sum(jnp.where(oh, cos, 0.0), axis=1, keepdims=True)
    marg = (tgt * math.cos(ARC_M2)
            - jnp.sqrt(jnp.maximum(1.0 - tgt * tgt, 0.0)) * math.sin(ARC_M2))
    logits = jnp.where(oh, marg, cos) * ARC_S
    mx = jnp.max(logits, axis=1, keepdims=True)
    e = jnp.exp(logits - mx)
    p = e / jnp.sum(e, axis=1, keepdims=True)
    p_t = jnp.sum(jnp.where(oh, p, 0.0), axis=1, keepdims=True)
    p_t = jnp.where(lab >= 0, p_t, 0.0)
    ref = -jnp.mean(jnp.log(jnp.maximum(p_t, 1e-30)))

    assert bool(jnp.isfinite(loss)), float(loss)
    assert abs(float(loss) - float(ref)) < 5e-3 * max(1.0, abs(float(ref))), (
        float(loss), float(ref))

    print("KERNEL_OK")
</pallas_src>

<mosaic_0001>
module attributes {stable_mosaic.version = 11 : i64} {
  func.func @_partial_fc_kernel(%arg0: i32, %arg1: i32, %arg2: memref<8x128xf32, #tpu.memory_space<vmem>>, %arg3: memref<128x128xf32, #tpu.memory_space<vmem>>, %arg4: memref<8x1xi32, #tpu.memory_space<vmem>>, %arg5: memref<8x1xf32, #tpu.memory_space<vmem>>, %arg6: memref<8x1xf32, #tpu.memory_space<vmem>>, %arg7: memref<8x1xf32, #tpu.memory_space<vmem>>, %arg8: memref<8x1xf32, #tpu.memory_space<vmem>>, %arg9: memref<8x1xf32, #tpu.memory_space<vmem>>) attributes {dimension_semantics = [#tpu.dimension_semantics<parallel>, #tpu.dimension_semantics<arbitrary>], iteration_bounds = array<i64: 2, 4>, scalar_prefetch = 0 : i64, scratch_operands = 4 : i64, tpu.core_type = #tpu.core_type<tc>, window_params = [{transform_indices = @transform_0, window_bounds = array<i64: 8, 128>}, {transform_indices = @transform_1, window_bounds = array<i64: 128, 128>}, {transform_indices = @transform_2, window_bounds = array<i64: 8, 1>}, {transform_indices = @transform_3, window_bounds = array<i64: 8, 1>}]} {
    %c0 = arith.constant 0 : index
    %c0_0 = arith.constant 0 : index
    %0 = vector.load %arg4[%c0, %c0_0] : memref<8x1xi32, #tpu.memory_space<vmem>>, vector<8x1xi32>
    %c0_i32 = arith.constant 0 : i32
    %1 = arith.cmpi eq, %arg1, %c0_i32 : i32
    %2 = arith.extui %1 : i1 to i32
    %c0_i32_1 = arith.constant 0 : i32
    %3 = arith.cmpi ne, %2, %c0_i32_1 : i32
    scf.if %3 {
      %c0_37 = arith.constant 0 : index
      %c0_38 = arith.constant 0 : index
      %82 = vector.load %arg2[%c0_37, %c0_38] : memref<8x128xf32, #tpu.memory_space<vmem>>, vector<8x128xf32>
      %83 = arith.mulf %82, %82 : vector<8x128xf32>
      %cst_39 = arith.constant dense<0.000000e+00> : vector<8xf32>
      %84 = vector.multi_reduction <add>, %83, %cst_39 [1] : vector<8x128xf32> to vector<8xf32>
      %85 = vector.shape_cast %84 : vector<8xf32> to vector<8x1xf32>
      %cst_40 = arith.constant 1.000000e-24 : f32
      %86 = vector.broadcast %cst_40 : f32 to vector<8x1xf32>
      %87 = arith.maximumf %85, %86 : vector<8x1xf32>
      %88 = math.rsqrt %87 : vector<8x1xf32>
      %c0_41 = arith.constant 0 : index
      %c0_42 = arith.constant 0 : index
      %89 = vector.load %arg9[%c0_41, %c0_42] : memref<8x1xf32, #tpu.memory_space<vmem>>, vector<8x1xf32>
      tpu.vector_store %arg9[%c0_41, %c0_42], %88 {strides = array<i32>} : memref<8x1xf32, #tpu.memory_space<vmem>>, vector<8x1xf32>,
      %cst_43 = arith.constant 0xFF800000 : f32
      %90 = vector.broadcast %cst_43 : f32 to vector<8x1xf32>
      %c0_44 = arith.constant 0 : index
      %c0_45 = arith.constant 0 : index
      %91 = vector.load %arg6[%c0_44, %c0_45] : memref<8x1xf32, #tpu.memory_space<vmem>>, vector<8x1xf32>
      tpu.vector_store %arg6[%c0_44, %c0_45], %90 {strides = array<i32>} : memref<8x1xf32, #tpu.memory_space<vmem>>, vector<8x1xf32>,
      %cst_46 = arith.constant 0.000000e+00 : f32
      %92 = vector.broadcast %cst_46 : f32 to vector<8x1xf32>
      %c0_47 = arith.constant 0 : index
      %c0_48 = arith.constant 0 : index
      %93 = vector.load %arg7[%c0_47, %c0_48] : memref<8x1xf32, #tpu.memory_space<vmem>>, vector<8x1xf32>
      tpu.vector_store %arg7[%c0_47, %c0_48], %92 {strides = array<i32>} : memref<8x1xf32, #tpu.memory_space<vmem>>, vector<8x1xf32>,
      %cst_49 = arith.constant 0.000000e+00 : f32
      %94 = vector.broadcast %cst_49 : f32 to vector<8x1xf32>
      %c0_50 = arith.constant 0 : index
      %c0_51 = arith.constant 0 : index
      %95 = vector.load %arg8[%c0_50, %c0_51] : memref<8x1xf32, #tpu.memory_space<vmem>>, vector<8x1xf32>
      tpu.vector_store %arg8[%c0_50, %c0_51], %94 {strides = array<i32>} : memref<8x1xf32, #tpu.memory_space<vmem>>, vector<8x1xf32>,
    } else {
    }
    %c0_2 = arith.constant 0 : index
    %c0_3 = arith.constant 0 : index
    %4 = vector.load %arg3[%c0_2, %c0_3] : memref<128x128xf32, #tpu.memory_space<vmem>>, vector<128x128xf32>
    %5 = arith.mulf %4, %4 : vector<128x128xf32>
    %cst = arith.constant dense<0.000000e+00> : vector<128xf32>
    %6 = vector.multi_reduction <add>, %5, %cst [1] : vector<128x128xf32> to vector<128xf32>
    %7 = vector.shape_cast %6 : vector<128xf32> to vector<128x1xf32>
    %cst_4 = arith.constant 1.000000e-24 : f32
    %8 = vector.broadcast %cst_4 : f32 to vector<128x1xf32>
    %9 = arith.maximumf %7, %8 : vector<128x1xf32>
    %10 = math.rsqrt %9 : vector<128x1xf32>
    %11 = vector.broadcast %10 : vector<128x1xf32> to vector<128x128xf32>
    %12 = arith.mulf %4, %11 : vector<128x128xf32>
    %13 = arith.truncf %12 : vector<128x128xf32> to vector<128x128xbf16>
    %c0_5 = arith.constant 0 : index
    %c0_6 = arith.constant 0 : index
    %14 = vector.load %arg2[%c0_5, %c0_6] : memref<8x128xf32, #tpu.memory_space<vmem>>, vector<8x128xf32>
    %15 = arith.truncf %14 : vector<8x128xf32> to vector<8x128xbf16>
    %cst_7 = arith.constant dense<0.000000e+00> : vector<8x128xf32>
    %16 = tpu.matmul %15, %13, %cst_7 {dimension_numbers = #tpu.dot_dimension_numbers<[1], [1], [0], [0], [0, 0, 1, 0], [], []>} : vector<8x128xbf16>, vector<128x128xbf16>, vector<8x128xf32> -> vector<8x128xf32>
    %c0_8 = arith.constant 0 : index
    %c0_9 = arith.constant 0 : index
    %17 = vector.load %arg9[%c0_8, %c0_9] : memref<8x1xf32, #tpu.memory_space<vmem>>, vector<8x1xf32>
    %18 = vector.broadcast %17 : vector<8x1xf32> to vector<8x128xf32>
    %19 = arith.mulf %16, %18 : vector<8x128xf32>
    %cst_10 = arith.constant -1.000000e+00 : f32
    %cst_11 = arith.constant 1.000000e+00 : f32
    %20 = vector.broadcast %cst_10 : f32 to vector<8x128xf32>
    %21 = arith.maximumf %20, %19 : vector<8x128xf32>
    %22 = vector.broadcast %cst_11 : f32 to vector<8x128xf32>
    %23 = arith.minimumf %22, %21 : vector<8x128xf32>
    %24 = tpu.iota {dimensions = array<i32: 1>} : vector<8x128xi32>
    %c128_i32 = arith.constant 128 : i32
    %25 = arith.muli %arg1, %c128_i32 : i32
    %26 = vector.broadcast %25 : i32 to vector<8x128xi32>
    %27 = arith.addi %24, %26 : vector<8x128xi32>
    %28 = vector.broadcast %0 : vector<8x1xi32> to vector<8x128xi32>
    %29 = arith.cmpi eq, %27, %28 : vector<8x128xi32>
    %c128_i32_12 = arith.constant 128 : i32
    %30 = arith.muli %arg1, %c128_i32_12 : i32
    %31 = vector.broadcast %30 : i32 to vector<8x1xi32>
    %32 = arith.cmpi sge, %0, %31 : vector<8x1xi32>
    %c1_i32 = arith.constant 1 : i32
    %33 = arith.addi %arg1, %c1_i32 : i32
    %c128_i32_13 = arith.constant 128 : i32
    %34 = arith.muli %33, %c128_i32_13 : i32
    %35 = vector.broadcast %34 : i32 to vector<8x1xi32>
    %36 = arith.cmpi slt, %0, %35 : vector<8x1xi32>
    %37 = arith.andi %32, %36 : vector<8x1xi1>
    %cst_14 = arith.constant 0.000000e+00 : f32
    %38 = vector.broadcast %cst_14 : f32 to vector<8x128xf32>
    %39 = arith.select %29, %23, %38 : vector<8x128xi1>, vector<8x128xf32>
    %cst_15 = arith.constant dense<0.000000e+00> : vector<8xf32>
    %40 = vector.multi_reduction <add>, %39, %cst_15 [1] : vector<8x128xf32> to vector<8xf32>
    %41 = vector.shape_cast %40 : vector<8xf32> to vector<8x1xf32>
    %42 = arith.mulf %41, %41 : vector<8x1xf32>
    %cst_16 = arith.constant 1.000000e+00 : f32
    %43 = vector.broadcast %cst_16 : f32 to vector<8x1xf32>
    %44 = arith.subf %43, %42 : vector<8x1xf32>
    %cst_17 = arith.constant 0.000000e+00 : f32
    %45 = vector.broadcast %cst_17 : f32 to vector<8x1xf32>
    %46 = arith.maximumf %44, %45 : vector<8x1xf32>
    %47 = math.sqrt %46 : vector<8x1xf32>
    %cst_18 = arith.constant 0.87758255 : f32
    %48 = vector.broadcast %cst_18 : f32 to vector<8x1xf32>
    %49 = arith.mulf %41, %48 : vector<8x1xf32>
    %cst_19 = arith.constant 0.47942555 : f32
    %50 = vector.broadcast %cst_19 : f32 to vector<8x1xf32>
    %51 = arith.mulf %47, %50 : vector<8x1xf32>
    %52 = arith.subf %49, %51 : vector<8x1xf32>
    %53 = vector.shape_cast %52 : vector<8x1xf32> to vector<8x1xf32>
    %54 = vector.broadcast %53 : vector<8x1xf32> to vector<8x128xf32>
    %55 = arith.select %29, %54, %23 : vector<8x128xi1>, vector<8x128xf32>
    %cst_20 = arith.constant 6.400000e+01 : f32
    %56 = vector.broadcast %cst_20 : f32 to vector<8x128xf32>
    %57 = arith.mulf %55, %56 : vector<8x128xf32>
    %c0_21 = arith.constant 0 : index
    %c0_22 = arith.constant 0 : index
    %58 = vector.load %arg6[%c0_21, %c0_22] : memref<8x1xf32, #tpu.memory_space<vmem>>, vector<8x1xf32>
    %cst_23 = arith.constant dense<0xFF800000> : vector<8xf32>
    %59 = vector.multi_reduction <maximumf>, %57, %cst_23 [1] : vector<8x128xf32> to vector<8xf32>
    %60 = vector.shape_cast %59 : vector<8xf32> to vector<8x1xf32>
    %61 = arith.maximumf %58, %60 : vector<8x1xf32>
    %c0_24 = arith.constant 0 : index
    %c0_25 = arith.constant 0 : index
    %62 = vector.load %arg7[%c0_24, %c0_25] : memref<8x1xf32, #tpu.memory_space<vmem>>, vector<8x1xf32>
    %63 = arith.subf %58, %61 : vector<8x1xf32>
    %64 = math.exp %63 : vector<8x1xf32>
    %65 = arith.mulf %62, %64 : vector<8x1xf32>
    %66 = vector.broadcast %61 : vector<8x1xf32> to vector<8x128xf32>
    %67 = arith.subf %57, %66 : vector<8x128xf32>
    %68 = math.exp %67 : vector<8x128xf32>
    %cst_26 = arith.constant dense<0.000000e+00> : vector<8xf32>
    %69 = vector.multi_reduction <add>, %68, %cst_26 [1] : vector<8x128xf32> to vector<8xf32>
    %70 = vector.shape_cast %69 : vector<8xf32> to vector<8x1xf32>
    %71 = arith.addf %65, %70 : vector<8x1xf32>
    %c0_27 = arith.constant 0 : index
    %c0_28 = arith.constant 0 : index
    %72 = vector.load %arg7[%c0_27, %c0_28] : memref<8x1xf32, #tpu.memory_space<vmem>>, vector<8x1xf32>
    tpu.vector_store %arg7[%c0_27, %c0_28], %71 {strides = array<i32>} : memref<8x1xf32, #tpu.memory_space<vmem>>, vector<8x1xf32>,
    %c0_29 = arith.constant 0 : index
    %c0_30 = arith.constant 0 : index
    %73 = vector.load %arg6[%c0_29, %c0_30] : memref<8x1xf32, #tpu.memory_space<vmem>>, vector<8x1xf32>
    tpu.vector_store %arg6[%c0_29, %c0_30], %61 {strides = array<i32>} : memref<8x1xf32, #tpu.memory_space<vmem>>, vector<8x1xf32>,
    %cst_31 = arith.constant 6.400000e+01 : f32
    %74 = vector.broadcast %cst_31 : f32 to vector<8x1xf32>
    %75 = arith.mulf %52, %74 : vector<8x1xf32>
    %c0_32 = arith.constant 0 : index
    %c0_33 = arith.constant 0 : index
    %76 = vector.load %arg8[%c0_32, %c0_33] : memref<8x1xf32, #tpu.memory_space<vmem>>, vector<8x1xf32>
    %77 = arith.select %37, %75, %76 : vector<8x1xi1>, vector<8x1xf32>
    %c0_34 = arith.constant 0 : index
    %c0_35 = arith.constant 0 : index
    %78 = vector.load %arg8[%c0_34, %c0_35] : memref<8x1xf32, #tpu.memory_space<vmem>>, vector<8x1xf32>
    tpu.vector_store %arg8[%c0_34, %c0_35], %77 {strides = array<i32>} : memref<8x1xf32, #tpu.memory_space<vmem>>, vector<8x1xf32>,
    %c3_i32 = arith.constant 3 : i32
    %79 = arith.cmpi eq, %arg1, %c3_i32 : i32
    %80 = arith.extui %79 : i1 to i32
    %c0_i32_36 = arith.constant 0 : i32
    %81 = arith.cmpi ne, %80, %c0_i32_36 : i32
    scf.if %81 {
      %c0_37 = arith.constant 0 : index
      %c0_38 = arith.constant 0 : index
      %82 = vector.load %arg8[%c0_37, %c0_38] : memref<8x1xf32, #tpu.memory_space<vmem>>, vector<8x1xf32>
      %c0_39 = arith.constant 0 : index
      %c0_40 = arith.constant 0 : index
      %83 = vector.load %arg6[%c0_39, %c0_40] : memref<8x1xf32, #tpu.memory_space<vmem>>, vector<8x1xf32>
      %84 = arith.subf %82, %83 : vector<8x1xf32>
      %c0_41 = arith.constant 0 : index
      %c0_42 = arith.constant 0 : index
      %85 = vector.load %arg7[%c0_41, %c0_42] : memref<8x1xf32, #tpu.memory_space<vmem>>, vector<8x1xf32>
      %86 = math.log %85 : vector<8x1xf32>
      %87 = arith.subf %84, %86 : vector<8x1xf32>
      %c0_i32_43 = arith.constant 0 : i32
      %88 = vector.broadcast %c0_i32_43 : i32 to vector<8x1xi32>
      %89 = arith.cmpi sge, %0, %88 : vector<8x1xi32>
      %cst_44 = arith.constant -69.0775528 : f32
      %90 = vector.broadcast %cst_44 : f32 to vector<8x1xf32>
      %91 = arith.select %89, %87, %90 : vector<8x1xi1>, vector<8x1xf32>
      %cst_45 = arith.constant -69.0775528 : f32
      %92 = vector.broadcast %cst_45 : f32 to vector<8x1xf32>
      %93 = arith.maximumf %91, %92 : vector<8x1xf32>
      %c0_46 = arith.constant 0 : index
      %c0_47 = arith.constant 0 : index
      %94 = vector.load %arg5[%c0_46, %c0_47] : memref<8x1xf32, #tpu.memory_space<vmem>>, vector<8x1xf32>
      tpu.vector_store %arg5[%c0_46, %c0_47], %93 {strides = array<i32>} : memref<8x1xf32, #tpu.memory_space<vmem>>, vector<8x1xf32>,
    } else {
    }
    return
  }
  func.func @transform_0(%arg0: i32, %arg1: i32) -> (i32, i32) {
    %c0_i32 = arith.constant 0 : i32
    %c0_i32_0 = arith.constant 0 : i32
    return %arg0, %c0_i32 : i32, i32
  }
  func.func @transform_1(%arg0: i32, %arg1: i32) -> (i32, i32) {
    %c0_i32 = arith.constant 0 : i32
    %c0_i32_0 = arith.constant 0 : i32
    return %arg1, %c0_i32 : i32, i32
  }
  func.func @transform_2(%arg0: i32, %arg1: i32) -> (i32, i32) {
    %c0_i32 = arith.constant 0 : i32
    %c0_i32_0 = arith.constant 0 : i32
    return %arg0, %c0_i32 : i32, i32
  }
  func.func @transform_3(%arg0: i32, %arg1: i32) -> (i32, i32) {
    %c0_i32 = arith.constant 0 : i32
    %c0_i32_0 = arith.constant 0 : i32
    return %arg0, %c0_i32 : i32, i32
  }
}

</mosaic_0001>

<bundles_post_ra>
// kernel: tpu_custom_call.1
= control target key start
LH: loop header
LB: loop body
LE: loop exit
PB: predicated region body
PF: predicated region fallthrough
CT: control target
= control target key end

     0   :  { %8 = vsyncpa [#allocation7], 0  ;;  %s1160_s0 = inlined_call_operand.vmem [shape: f32[16,128], index: 0, kind: input, shape index: {}]   ;;  %s1161_s1 = inlined_call_operand.hbm [shape: f32[512,128], index: 1, kind: input, shape index: {}]   ;;  %s1162_s2 = inlined_call_operand.vmem [shape: s32[16,1], index: 2, kind: input, shape index: {}]   ;;  %s1163_s3 = inlined_call_operand.vmem [shape: f32[16,1], index: 3, kind: output, shape index: {}]  }
   0x1   :  { %10 = vsyncpa [#allocation7 + $0x1], 0  ;;  %s896_s12 = smov 0   ;;  %s898_s13 = smov 0  }
   0x2   :  { %s900_s14 = smov 0   ;;  %s902_s15 = smov 0  }
   0x3   :  { %s904_s16 = smov 0   ;;  %s906_s17 = smov 0  }
   0x4   :  { %s908_s18 = smov 0   ;;  %s910_s19 = smov 0  }
   0x5 LB: > { %s599_s20 = sadd.s32 4294967295, %s866_s19   ;;  %s25_s21 = sadd.s32 1, %s858_s17  ;;  %s866_s19 = sphi %s910_s19, %s16_s19   ;;  %s862_s18 = sphi %s908_s18, %s1175_s18   ;;  %s858_s17 = sphi %s906_s17, %s1174_s17   ;;  %s854_s16 = sphi %s904_s16, %s1173_s16   ;;  %s850_s15 = sphi %s902_s15, %s1172_s15   ;;  %s846_s14 = sphi %s900_s14, %s1171_s14   ;;  %s842_s13 = sphi %s898_s13, %s1170_s13   ;;  %s838_s12 = sphi %s896_s12, %s1169_s12  }
   0x6   : > { %p26_p0 = scmp.ge.s32.totalorder %s25_s21, 4  ;;  %s28_s22 = sadd.s32 1, %s862_s18 }
   0x7   : > { %s61_s23 = sadd.s32 1, %s846_s14  ;;  %p68_p1 = scmp.ne.s32.totalorder %s846_s14, %s842_s13 }
   0x8   : > { %s1177_s21 = smov (%p26_p0, %s25_s21), 0  ;;  %s1179_s22 = smov (!%p26_p0, %s28_s22), %s862_s18 }
   0x9   : > { %s58_s24 = ssub.s32 %s858_s17, %s1177_s21  ;;  %p69_p2 = scmp.eq.s32.totalorder %s866_s19, 0 }
   0xa   : > { %p30_p3 = scmp.ge.s32.totalorder %s1179_s22, 2  ;;  %p59_p4 = scmp.eq.s32.totalorder %s58_s24, 0 }
   0xb   : > { %p946_p5 = por %p69_p2, %p68_p1  ;;  %p74_p6 = scmp.ne.s32.totalorder %s842_s13, %s838_s12 }
   0xc   : > { %s1181_s22 = smov (%p30_p3, %s1179_s22), 0  ;;  %p75_p7 = scmp.eq.s32.totalorder %s599_s20, 0 }
   0xd   : > { %s954_s26 = scalar_select %p59_p4, %s846_s14, %s61_s23  }
   0xe   : > { %p656_p8 = scmp.lt.s32.totalorder %s866_s19, 8  ;;  %s157_s27 = sand.u32 1, %s846_s14  }
   0xf   : > { %p958_p9 = por %p75_p7, %p74_p6  ;;  %s603_s29 = sshll.u32 %s157_s27, 7 }
  0x10   : > { %s618_s30 = sshll.u32 %s858_s17, 11  ;;  %s161_s7 = scalar_lea.vmem [#allocation6], %s603_s29 }
  0x11   : > { %s167_s6 = scalar_lea.hbm %s1161_s1, %s618_s30  ;;  %s168_s8 = sshll.u32 %s161_s7, 4  ;;  %s169_s8 = int_to_ptr.vmem [resolvable:$true] %s168_s8 }
  0x12   : > { %p968_p10 = pnand %p656_p8, %p946_p5  ;;  %s158_s10 = scalar_lea.sflag [#allocation7], %s157_s27 }
  0x13   : > { %s785_s11 = scalar_lea.vmem %s169_s8, 2048  ;;  %s868_s12 = smov [#allocation6]  }
  0x14   : > { %p774_p11 = pneg %p968_p10  ;;  %p786_p12 = scmp.ne.s32.totalorder %s169_s8, %s785_s11 }
  0x15   : > { %s790_s20 = sshll.u32 %s868_s12, 4  ;;  %s791_s20 = int_to_ptr.vmem [resolvable:$false] %s790_s20 }
  0x16   : > { %p788_p13 = pnand %p786_p12, %p774_p11  ;;  %s792_s23 = scalar_lea.vmem %s791_s20, 4096 }
  0x17   : > { %p793_p1 = scmp.lt.s32.totalorder %s169_s8, %s791_s20  ;;  %p794_p2 = scmp.lt.s32.totalorder %s792_s23, %s785_s11 }
  0x18   : > { %p789_p0 = pneg %p788_p13 }
  0x19   : > { %p795_p3 = por %p794_p2, %p793_p1 }
  0x1b   : > { %p796_p4 = pnand %p795_p3, %p789_p0 }
  0x1d   : > { %799 = shalt.err (!%p796_p4)
}
  0x1e   : > { %s869_s24 = smov 128   ;;  %s870_s25 = smov 8  }
  0x1f   : > { %655 = dma.hbm_to_vmem [thread:$0]  (!%p968_p10), %s167_s6, 2048, %s169_s8, %s158_s10, %s869_s24, %s869_s24, %s870_s25  }
  0x20   : > { %p606_p5 = scmp.ge.s32.totalorder %s866_s19, 1  ;;  %p183_p6 = scmp.lt.s32.totalorder %s866_s19, 9 }
  0x22   : > { %p184_p7 = pnand %p606_p5, %p183_p6 }
  0x23   : > { %s189_s27 = sand.u32 (!%p184_p7), 1, %s842_s13  }
  0x24   : > { %187 = sbr.rel (%p184_p7) target bundleno = 1254 (0x4e6), region = 32  ;;  %s607_s29 = sshll.u32 (!%p184_p7), %s189_s27, 7 }
  0x25   : > { %s190_s30 = scalar_lea.sflag (!%p184_p7), [#allocation7], %s189_s27  ;;  %s979_s4 = scalar_lea.vmem (!%p184_p7), [#allocation6], %s607_s29 }
  0x29   : > { %833 = dma.done.wait (%p958_p9), %s190_s30, 2048  }
  0x2a   : > { %835 = vsyncadd (%p958_p9), %s190_s30, 4294965248  ;;  %p223_p8 = scmp.lt.s32.totalorder %s854_s16, 1  ;;  %p611_p9 = scmp.ne.s32.totalorder %s850_s15, 0 }
  0x2c   : > { %s1183_s16 = smov (!%p223_p8, %s854_s16), 1  ;;  %241 = sbr.rel (%p611_p9) target bundleno = 207 (0xcf), region = 40 }
  0x2d   : > { %s987_s5 = sshll.u32 %s1183_s16, 3 }
  0x2e   : > { %s993_s8 = scalar_lea.vmem %s1160_s0, %s987_s5  ;;  %s231_s11 = scalar_lea.vmem %s1162_s2, %s987_s5 }
  0x2f   : > { %s235_s20 = scalar_lea.vmem %s1163_s3, %s987_s5  ;;  %v1003_v0 = vld [vmem:[%s231_s11] sm:$0xff] }
  0x31   : > { %v242_v1 = vld [vmem:[%s993_s8] sm:$0xff]  ;;  %vm248_vm0 = vcmask 7168   ;;  %v871_v3 = vmov -inf   ;;  %v872_v4 = vmov 0.0  }
  0x32   : > { %v243_v2 = vmul.f32 %v242_v1, %v242_v1  ;;  %250 = vst.msk [vmem:[#allocation2] sm:$0xff] %vm248_vm0, %v871_v3  ;;  %251 = vst.msk [vmem:[#allocation3] sm:$0xff] %vm248_vm0, %v872_v4 }
  0x33   : > { %252 = vst.msk [vmem:[#allocation4] sm:$0xff] %vm248_vm0, %v872_v4 }
  0x34   : > { %244 = vadd.xlane.f32.xlu0 %v243_v2 }
  0xbd   : > { %v245_v5 = vpop.xlane.xlu0 %244 }
  0xbe   : > { %v246_v6 = vmax.f32 %v245_v5, 1e-24 }
  0xc0   : > { %728 = vrsqrt.f32 %v246_v6 }
  0xcd   : > { %v729_v7 = vpop.eup %728 }
  0xce   : > { %249 = vst.msk [vmem:[#allocation5] sm:$0xff] %vm248_vm0, %v729_v7 }
  0xcf PF: > { %v1008_v8 = vld [vmem:[%s979_s4 + $0x70] sm:$0xff]  ;;  %v1011_v9 = vld [vmem:[%s979_s4 + $0x78] sm:$0xff]  ;;  %v1014_v10 = vld [vmem:[%s979_s4 + $0x60] sm:$0xff]  ;;  %v873_v38 = vmov 0.0   ;;  %vm874_vm1 = vmmov 0   ;;  %v875_v42 = vmov 0  }
  0xd0   : > { %v283_v11 = vmul.f32 %v1008_v8, %v1008_v8  ;;  %v281_v12 = vmul.f32 %v1014_v10, %v1014_v10  ;;  %v1021_v13 = vld [vmem:[%s979_s4 + $0x68] sm:$0xff]  ;;  %v284_v14 = vmul.f32 %v1011_v9, %v1011_v9  ;;  %v1028_v16 = vld [vmem:[%s979_s4 + $0x58] sm:$0xff]  ;;  %v1031_v17 = vld [vmem:[%s979_s4 + $0x50] sm:$0xff]  ;;  %630 = vmatprep.subr.bf16.mxu0 %v873_v38  ;;  %646 = vmatprep.mubr.msk.bf16.mxu0 %vm874_vm1, %v873_v38  ;;  %s613_s16 = sshll.u32 %s850_s15, 7  ;;  %vm477_vm8 = vcmask 7168   ;;  %p615_p10 = scmp.ne.s32.totalorder %s850_s15, 3 }
  0xd1   : > { %v282_v15 = vmul.f32 %v1021_v13, %v1021_v13  ;;  %v280_v18 = vmul.f32 %v1028_v16, %v1028_v16  ;;  %v279_v19 = vmul.f32 %v1031_v17, %v1031_v17  ;;  %v1038_v20 = vld [vmem:[%s979_s4 + $0x48] sm:$0xff]  ;;  %v1041_v21 = vld [vmem:[%s979_s4 + $0x40] sm:$0xff]  ;;  %v1048_v24 = vld [vmem:[%s979_s4 + $0x38] sm:$0xff]  ;;  %730 = vset.pattern.permute.xlu0 %v875_v42  ;;  %731 = vset.pattern.permute.xlu1 %v875_v42  ;;  %s620_s23 = sadd.s32 128, %s613_s16 }
  0xd2   : > { %313 = vadd.xlane.f32.xlu0 %v283_v11  ;;  %309 = vadd.xlane.f32.xlu1 %v281_v12  ;;  %v278_v22 = vmul.f32 %v1038_v20, %v1038_v20  ;;  %v277_v23 = vmul.f32 %v1041_v21, %v1041_v21  ;;  %v1051_v25 = vld [vmem:[%s979_s4 + $0x30] sm:$0xff]  ;;  %v276_v26 = vmul.f32 %v1048_v24, %v1048_v24  ;;  %v1058_v28 = vld [vmem:[%s979_s4 + $0x28] sm:$0xff]  ;;  %v1061_v29 = vld [vmem:[%s979_s4 + $0x20] sm:$0xff] }
  0xd3   : > { %v275_v27 = vmul.f32 %v1051_v25, %v1051_v25  ;;  %v274_v30 = vmul.f32 %v1058_v28, %v1058_v28  ;;  %v273_v31 = vmul.f32 %v1061_v29, %v1061_v29  ;;  %v1068_v32 = vld [vmem:[%s979_s4 + $0x18] sm:$0xff]  ;;  %v1071_v33 = vld [vmem:[%s979_s4 + $0x10] sm:$0xff]  ;;  %v1078_v36 = vld [vmem:[%s979_s4 + $0x8] sm:$0xff] }
  0xd4   : > { %v272_v34 = vmul.f32 %v1068_v32, %v1068_v32  ;;  %v271_v35 = vmul.f32 %v1071_v33, %v1071_v33  ;;  %v1081_v37 = vld [vmem:[%s979_s4] sm:$0xff]  ;;  %v270_v39 = vmul.f32 %v1078_v36, %v1078_v36 }
  0xd5   : > { %v269_v40 = vmul.f32 %v1081_v37, %v1081_v37  ;;  %v415_v41 = vld [vmem:[#allocation5] sm:$0xff] }
  0xd6   : > { %315 = vadd.xlane.f32.xlu0 %v284_v14  ;;  %311 = vadd.xlane.f32.xlu1 %v282_v15 }
  0xda   : > { %307 = vadd.xlane.f32.xlu1 %v280_v18  ;;  %305 = vadd.xlane.f32.xlu0 %v279_v19 }
  0xde   : > { %303 = vadd.xlane.f32.xlu1 %v278_v22  ;;  %301 = vadd.xlane.f32.xlu0 %v277_v23 }
  0xe2   : > { %299 = vadd.xlane.f32.xlu1 %v276_v26  ;;  %297 = vadd.xlane.f32.xlu0 %v275_v27 }
  0xe6   : > { %295 = vadd.xlane.f32.xlu1 %v274_v30  ;;  %293 = vadd.xlane.f32.xlu0 %v273_v31 }
  0xea   : > { %291 = vadd.xlane.f32.xlu1 %v272_v34  ;;  %289 = vadd.xlane.f32.xlu0 %v271_v35 }
  0xee   : > { %287 = vadd.xlane.f32.xlu1 %v270_v39  ;;  %285 = vadd.xlane.f32.xlu0 %v269_v40 }
  0xff   : > { %430 = vperm.xlu1 %731, %v1003_v0  }
 0x104   : > { %418 = vperm.xlu0 %730, %v415_v41  }
 0x15b   : > { %v314_v43 = vpop.xlane.xlu0 %313  ;;  %v310_v44 = vpop.xlane.xlu1 %309 }
 0x15c   : > { %v331_v45 = vmax.f32 %v314_v43, 1e-24  ;;  %v329_v49 = vmax.f32 %v310_v44, 1e-24 }
 0x15e   : > { %732 = vrsqrt.f32 %v331_v45 }
 0x15f   : > { %v316_v46 = vpop.xlane.xlu0 %315  ;;  %v312_v47 = vpop.xlane.xlu1 %311 }
 0x160   : > { %v332_v48 = vmax.f32 %v316_v46, 1e-24  ;;  %v330_v50 = vmax.f32 %v312_v47, 1e-24 }
 0x162   : > { %734 = vrsqrt.f32 %v332_v48 }
 0x163   : > { %v308_v51 = vpop.xlane.xlu1 %307  ;;  %736 = vrsqrt.f32 %v329_v49  ;;  %v306_v52 = vpop.xlane.xlu0 %305 }
 0x164   : > { %738 = vrsqrt.f32 %v330_v50  ;;  %v328_v53 = vmax.f32 %v308_v51, 1e-24  ;;  %v327_v54 = vmax.f32 %v306_v52, 1e-24 }
 0x166   : > { %740 = vrsqrt.f32 %v328_v53 }
 0x167   : > { %742 = vrsqrt.f32 %v327_v54  ;;  %v304_v55 = vpop.xlane.xlu1 %303  ;;  %v302_v57 = vpop.xlane.xlu0 %301 }
 0x168   : > { %v326_v59 = vmax.f32 %v304_v55, 1e-24  ;;  %v325_v62 = vmax.f32 %v302_v57, 1e-24  ;;  %v373_v57 = vld [vmem:[%s993_s8] sm:$0xff] }
 0x16a   : > { %744 = vrsqrt.f32 %v326_v59 }
 0x16b   : > { %v733_v56 = vpop.eup %732  ;;  %746 = vrsqrt.f32 %v325_v62  ;;  %v300_v3 = vpop.xlane.xlu1 %299 }
 0x16c   : > { %v363_v60 = vmul.f32 %v733_v56, %v1008_v8  ;;  %v298_v4 = vpop.xlane.xlu0 %297  ;;  %v324_v7 = vmax.f32 %v300_v3, 1e-24 }
 0x16d   : > { %v323_v8 = vmax.f32 %v298_v4, 1e-24 }
 0x16e   : > { %748 = vrsqrt.f32 %v324_v7 }
 0x16f   : > { %v735_v58 = vpop.eup %734  ;;  %750 = vrsqrt.f32 %v323_v8  ;;  %v296_v18 = vpop.xlane.xlu1 %295 }
 0x170   : > { %v364_v61 = vmul.f32 %v735_v58, %v1011_v9  ;;  %v737_v63 = vpop.eup %736  ;;  %v294_v19 = vpop.xlane.xlu0 %293  ;;  %v322_v22 = vmax.f32 %v296_v18, 1e-24  ;;  %v374_v58 = vpack.c.bf16 %v373_v57, %v373_v57 }
 0x171   : > { %v739_v2 = vpop.eup %738  ;;  %v361_v5 = vmul.f32 %v737_v63, %v1014_v10 }
 0x172   : > { %v372_v1 = vpack.c.bf16 %v364_v61, %v363_v60  ;;  %v362_v6 = vmul.f32 %v739_v2, %v1021_v13  ;;  %v321_v13 = vmax.f32 %v294_v19, 1e-24  ;;  %752 = vrsqrt.f32 %v322_v22 }
 0x173   : > { %v741_v11 = vpop.eup %740  ;;  %v292_v31 = vpop.xlane.xlu1 %291 }
 0x174   : > { %631 = vmatpush3.bf16.xpose.msra.mxu0 %v372_v1  ;;  %v743_v12 = vpop.eup %742  ;;  %v371_v9 = vpack.c.bf16 %v362_v6, %v361_v5  ;;  %v360_v15 = vmul.f32 %v741_v11, %v1028_v16  ;;  %754 = vrsqrt.f32 %v321_v13  ;;  %v290_v16 = vpop.xlane.xlu0 %289 }
 0x175   : > { %632 = vmatprep.subr.bf16.mxu0 %v873_v38  ;;  %v359_v14 = vmul.f32 %v743_v12, %v1031_v17  ;;  %v320_v17 = vmax.f32 %v292_v31, 1e-24  ;;  %v319_v39 = vmax.f32 %v290_v16, 1e-24  ;;  %v457_v31 = vld [vmem:[#allocation2] sm:$0xff] }
 0x177   : > { %v745_v10 = vpop.eup %744  ;;  %v370_v23 = vpack.c.bf16 %v360_v15, %v359_v14  ;;  %756 = vrsqrt.f32 %v320_v17  ;;  %v288_v43 = vpop.xlane.xlu1 %287 }
 0x178   : > { %v747_v26 = vpop.eup %746  ;;  %v358_v30 = vmul.f32 %v745_v10, %v1038_v20  ;;  %758 = vrsqrt.f32 %v319_v39  ;;  %v286_v20 = vpop.xlane.xlu0 %285 }
 0x179   : > { %v357_v27 = vmul.f32 %v747_v26, %v1041_v21  ;;  %v318_v21 = vmax.f32 %v288_v43, 1e-24  ;;  %v317_v46 = vmax.f32 %v286_v20, 1e-24  ;;  %v461_v20 = vld [vmem:[#allocation3] sm:$0xff] }
 0x17b   : > { %v749_v34 = vpop.eup %748  ;;  %v369_v35 = vpack.c.bf16 %v358_v30, %v357_v27  ;;  %760 = vrsqrt.f32 %v318_v21  ;;  %v431_v61 = vpop.permute.xlu1 %430 }
 0x17c   : > { %633 = vmatpush3.bf16.xpose.msra.mxu0 %v371_v9  ;;  %v751_v40 = vpop.eup %750  ;;  %v356_v42 = vmul.f32 %v749_v34, %v1048_v24  ;;  %762 = vrsqrt.f32 %v317_v46 }
 0x17d   : > { %634 = vmatprep.subr.bf16.mxu0 %v873_v38  ;;  %v355_v41 = vmul.f32 %v751_v40, %v1051_v25 }
 0x17f   : > { %v753_v44 = vpop.eup %752  ;;  %v368_v45 = vpack.c.bf16 %v356_v42, %v355_v41 }
 0x180   : > { %v354_v49 = vmul.f32 %v753_v44, %v1058_v28 }
 0x181   : > { %v755_v47 = vpop.eup %754 }
 0x182   : > { %v353_v48 = vmul.f32 %v755_v47, %v1061_v29 }
 0x184   : > { %635 = vmatpush3.bf16.xpose.msra.mxu0 %v370_v23  ;;  %v757_v25 = vpop.eup %756  ;;  %v367_v24 = vpack.c.bf16 %v354_v49, %v353_v48  ;;  %v481_v23 = vld [vmem:[#allocation4] sm:$0xff] }
 0x185   : > { %636 = vmatprep.subr.bf16.mxu0 %v873_v38  ;;  %v759_v50 = vpop.eup %758  ;;  %v352_v52 = vmul.f32 %v757_v25, %v1068_v32  ;;  %v436_v32 = vstv %s620_s23 }
 0x186   : > { %v351_v51 = vmul.f32 %v759_v50, %v1071_v33  ;;  %v427_v33 = vstv %s613_s16  ;;  %vm437_vm3 = vcmp.lt.s32.totalorder %v1003_v0, %v436_v32 }
 0x187   : > { %vm433_vm2 = vcmp.ge.s32.totalorder %v1003_v0, %v427_v33 }
 0x188   : > { %v761_v53 = vpop.eup %760  ;;  %v366_v54 = vpack.c.bf16 %v352_v52, %v351_v51  ;;  %vm1117_vm4 = vmand %vm433_vm2, %vm437_vm3 }
 0x189   : > { %v763_v55 = vpop.eup %762  ;;  %v350_v29 = vmul.f32 %v761_v53, %v1078_v36  ;;  %v424_v36 = vlaneseq }
 0x18a   : > { %v349_v28 = vmul.f32 %v763_v55, %v1081_v37 }
 0x18b   : > { %v425_v37 = vand.u32 127, %v424_v36 }
 0x18c   : > { %637 = vmatpush3.bf16.xpose.msra.mxu0 %v369_v35  ;;  %v365_v56 = vpack.c.bf16 %v350_v29, %v349_v28 }
 0x18d   : > { %638 = vmatprep.subr.bf16.mxu0 %v873_v38  ;;  %v428_v60 = vadd.s32 %v427_v33, %v425_v37 }
 0x18f   : > { %vm432_vm5 = vcmp.eq.s32.totalorder %v428_v60, %v431_v61 }
 0x194   : > { %639 = vmatpush3.bf16.xpose.msra.mxu0 %v368_v45 }
 0x195   : > { %640 = vmatprep.subr.bf16.mxu0 %v873_v38 }
 0x19c   : > { %641 = vmatpush3.bf16.xpose.msra.mxu0 %v367_v24 }
 0x19d   : > { %642 = vmatprep.subr.bf16.mxu0 %v873_v38 }
 0x1a4   : > { %643 = vmatpush3.bf16.xpose.msra.mxu0 %v366_v54 }
 0x1a5   : > { %644 = vmatprep.subr.bf16.mxu0 %v873_v38  ;;  %v419_v38 = vpop.permute.xlu0 %418 }
 0x1ac   : > { %645 = vmatpush3.bf16.xpose.msra.mxu0 %v365_v56 }
 0x1b3   : > { %647 = vmatmul.mubr.bf16.vlgmr.msra.gmra.mxu0 %v374_v58 }
 0x273   : > { %v409_v62 = vpop.f32.mrf.mxu0 }
 0x274   : > { %v421_v63 = vmul.f32 %v419_v38, %v409_v62 }
 0x275   : > { %v648_v1 = vpop.f32.mrf.mxu0 }
 0x276   : > { %v612_v2 = vclamps-f32 %v421_v63, 1.0 }
 0x277   : > { %v412_v3 = vpop.f32.mrf.mxu0 }
 0x278   : > { %v439_v4 = vsel %vm432_vm5, %v612_v2, 0.0 }
 0x279   : > { %v649_v5 = vpop.f32.mrf.mxu0  ;;  %440 = vadd.xlane.f32.xlu1 %v439_v4 }
 0x302   : > { %v441_v6 = vpop.xlane.xlu1 %440 }
 0x303   : > { %v442_v7 = vmul.f32 %v441_v6, %v441_v6  ;;  %v452_v19 = vmul.f32 0.87758255, %v441_v6 }
 0x305   : > { %v443_v11 = vsub.f32 1.0, %v442_v7 }
 0x307   : > { %v444_v8 = vmax.f32 %v443_v11, 0.0 }
 0x309   : > { %764 = vrsqrt.f32 %v444_v8  ;;  %vm447_vm6 = vcmp.eq.f32.partialorder %v444_v8, inf  ;;  %v450_v14 = vand.u32 2147483648, %v444_v8  ;;  %vm449_vm7 = vcmp.eq.f32.partialorder %v444_v8, 0.0 }
 0x316   : > { %v765_v12 = vpop.eup %764 }
 0x317   : > { %v446_v9 = vmul.f32 %v765_v12, %v444_v8 }
 0x319   : > { %v448_v15 = vsel %vm447_vm6, %v444_v8, %v446_v9 }
 0x31a   : > { %v451_v18 = vsel %vm449_vm7, %v450_v14, %v448_v15 }
 0x31b   : > { %v453_v22 = vmul.f32 0.47942555, %v451_v18 }
 0x31d   : > { %v454_v10 = vsub.f32 %v452_v19, %v453_v22 }
 0x31f   : > { %v480_v13 = vmul.f32 64.0, %v454_v10  ;;  %v455_v26 = vsel %vm432_vm5, %v454_v10, %v612_v2 }
 0x320   : > { %v456_v27 = vmul.f32 64.0, %v455_v26 }
 0x321   : > { %v482_v30 = vsel %vm1117_vm4, %v480_v13, %v481_v23 }
 0x322   : > { %458 = vmax.xlane.f32.xlu0 %v456_v27  ;;  %483 = vst.msk [vmem:[#allocation4] sm:$0xff] %vm477_vm8, %v482_v30 }
 0x3ab   : > { %v459_v16 = vpop.xlane.xlu0 %458 }
 0x3ac   : > { %v460_v17 = vmax.f32 %v457_v31, %v459_v16 }
 0x3ae   : > { %v462_v34 = vsub.f32 %v457_v31, %v460_v17  ;;  %479 = vst.msk [vmem:[#allocation2] sm:$0xff] %vm477_vm8, %v460_v17  ;;  %468 = vperm.xlu1 %731, %v460_v17  }
 0x3b0   : > { %v463_v42 = vmul.f32 1.442695, %v462_v34 }
 0x429   : > { %v469_v35 = vpop.permute.xlu1 %468 }
 0x42a   : > { %v471_v39 = vsub.f32 %v456_v27, %v469_v35 }
 0x42c   : > { %v472_v40 = vmul.f32 1.442695, %v471_v39 }
 0x42e   : > { %766 = vpow2.f32 %v472_v40 }
 0x42f   : > { %768 = vpow2.f32 %v463_v42 }
 0x43b   : > { %v767_v41 = vpop.eup %766 }
 0x43c   : > { %474 = vadd.xlane.f32.xlu1 %v767_v41  ;;  %v769_v43 = vpop.eup %768 }
 0x43d   : > { %v465_v21 = vmul.f32 %v769_v43, %v461_v20 }
 0x4c4   : > { %487 = sbr.rel (%p615_p10) target bundleno = 1254 (0x4e6), region = 44 }
 0x4c5   : > { %v475_v44 = vpop.xlane.xlu1 %474 }
 0x4c6   : > { %v476_v45 = vadd.f32 %v475_v44, %v465_v21 }
 0x4c8   : > { %478 = vst.msk [vmem:[#allocation3] sm:$0xff] %vm477_vm8, %v476_v45 }
 0x4c9   : > { %v488_v47 = vld [vmem:[#allocation4] sm:$0xff]  ;;  %v489_v48 = vld [vmem:[#allocation2] sm:$0xff]  ;;  %vm495_vm9 = vcmp.ge.s32.totalorder %v1003_v0, 0 }
 0x4ca   : > { %v490_v49 = vsub.f32 %v488_v47, %v489_v48 }
 0x4cf   : > { %v491_v46 = vld [vmem:[#allocation3] sm:$0xff] }
 0x4d0   : > { %770 = vlog2.f32 %v491_v46 }
 0x4dd   : > { %v771_v25 = vpop.eup %770 }
 0x4de   : > { %v493_v24 = vmul.f32 0.6931472, %v771_v25 }
 0x4e0   : > { %v494_v50 = vsub.f32 %v490_v49, %v493_v24 }
 0x4e2   : > { %v496_v51 = vsel %vm495_vm9, %v494_v50, -69.07755 }
 0x4e3   : > { %v497_v52 = vmax.f32 %v496_v51, -69.07755 }
 0x4e5   : > { %498 = vst.msk [vmem:[%s235_s20] sm:$0xff] %vm477_vm8, %v497_v52 }
 0x4e6 PF: > { %s16_s19 = sadd.s32 1, %s866_s19   ;;  %s1169_s12 = smov %s842_s13 }
 0x4e7   : > { %p13_p11 = scmp.ge.s32.totalorder %s16_s19, 10   ;;  %s1170_s13 = smov %s846_s14 }
 0x4e8   : > { %s1171_s14 = smov %s954_s26  ;;  %s1172_s15 = smov %s858_s17 }
 0x4e9   : > { %s1173_s16 = smov %s862_s18  ;;  %s1174_s17 = smov %s1177_s21 }
 0x4ea   : > { %s1175_s18 = smov %s1181_s22  ;;  %15 = sbr.rel (!%p13_p11) target bundleno = 5 (0x5), region = 86 }
 0x4ef   :  { %518 = vsyncpa [#allocation7], 1 }
 0x4f0   :  { %520 = vsyncpa [#allocation7 + $0x1], 1 }

</bundles_post_ra>
